<compile_context>
chip_gen: v7x
topology: tpu7x:2x2x1
jax: 0.10.0
libtpu: 0.0.40
codegen_flags: <defaults>
</compile_context>

<pallas_src>
import jax
import jax.numpy as jnp
from jax.experimental import pallas as pl
from jax.experimental.pallas import tpu as pltpu


# ----------------------------------------------------------------------------
# Pallas kernel: one (tm, C) text row-block -> relationship descriptor for ALL
# batch elements (B folded into the body; img table is VMEM resident).
# ----------------------------------------------------------------------------
def _rd_class_embed_kernel(text_ref, img_ref, wa_ref, wb_ref, bias_ref, out_ref):
    # text_ref : (tm, C)    bf16   text-classifier rows of this t-block
    # img_ref  : (B, 1, C)  bf16   full clip-embedding table (VMEM resident)
    # wa_ref   : (C, C)     bf16   class_embed.weight[:, :C].T
    # wb_ref   : (C, C)     bf16   class_embed.weight[:, C:].T
    # bias_ref : (1, C)     f32
    # out_ref  : (B, tm, C) f32
    text = text_ref[...]                                            # (tm, C) bf16
    # Batch-invariant half of the fused concat+Linear: computed once per
    # t-block, shared by every batch element in the loop below.
    kb = jnp.dot(text, wb_ref[...],
                 preferred_element_type=jnp.float32) + bias_ref[...]  # (tm, C) f32
    wa = wa_ref[...]                                                 # (C, C) bf16
    n_batch = out_ref.shape[0]                                       # static
    for b in range(n_batch):                                         # unrolled at trace time
        rd = text * img_ref[b]                # 't c, b c -> b t c' for this b, bf16
        # TODO(synk): for T >> C, row-scale wa once per b instead
        # (text @ (diag(img_b) @ wa)) to cut VPU work; marginal at these sizes.
        out_ref[b] = jnp.dot(rd, wa, preferred_element_type=jnp.float32) + kb


def _choose_row_tile(t):
    """Fixed, 16-row-aligned (bf16 sublane packing) row tile over T."""
    if t <= 128:
        return ((t + 15) // 16) * 16      # tiny problem: single small step
    if t <= 1024:
        return 128                        # keeps >=2 grid steps (v7x megacore)
    return 512                            # FC-CLIP-scale template counts


def relationship_descriptor(text, img, wa_bf16, wb_bf16, bias_f32):
    """Pallas implementation of FCCLIPHead.get_relationship_descriptor (2-D text).

    text     : (T, C)  shared text classifier
    img      : (B, C)  clip embeddings
    wa_bf16  : (C, C)  = class_embed.weight[:, :C].T  (bf16, pre-cast at init)
    wb_bf16  : (C, C)  = class_embed.weight[:, C:].T  (bf16, pre-cast at init)
    bias_f32 : (1, C)
    returns  : (B, T, C) float32
    """
    T, C = text.shape
    B, _ = img.shape

    tm = _choose_row_tile(T)
    num_tb = pl.cdiv(T, tm)
    Tp = num_tb * tm

    # bf16 MXU operands, f32 accumulation inside the kernel.
    text_bf = text.astype(jnp.bfloat16)
    if Tp != T:
        text_bf = jnp.pad(text_bf, ((0, Tp - T), (0, 0)))
    img3d = img.astype(jnp.bfloat16).reshape(B, 1, C)

    # VMEM budget: double-buffer worst case + 2x headroom; cap at 48 MiB so the
    # pipeline keeps scratch headroom even on v7x (64 MiB physical VMEM).
    est = (2 * tm * C * 2            # text  (bf16)
           + 2 * B * C * 2           # img   (bf16, resident)
           + 2 * 2 * C * C * 2       # wa+wb (bf16, resident)
           + 2 * C * 4               # bias  (f32)
           + 2 * B * tm * C * 4)     # out   (f32)
    vmem_limit = int(min(max(2 * est, 16 << 20), 48 << 20))

    cost = pl.CostEstimate(
        flops=2 * Tp * C * C * (B + 1),          # B rd-dots + 1 kb-dot per t-block
        transcendentals=0,
        bytes_accessed=(Tp * C * 2 + B * C * 2 + 2 * C * C * 2 + C * 4
                        + B * Tp * C * 4),
    )

    # TODO(synk): the f32 output (largest HBM stream) could be bf16 since
    # FC-CLIP L2-normalizes the classifier downstream; kept f32 to preserve the
    # module's `.float()` semantics.
    out = pl.pallas_call(
        _rd_class_embed_kernel,
        out_shape=jax.ShapeDtypeStruct((B, Tp, C), jnp.float32),
        grid_spec=pltpu.PrefetchScalarGridSpec(
            num_scalar_prefetch=0,
            grid=(num_tb,),
            in_specs=[
                pl.BlockSpec((tm, C), lambda j: (j, 0)),        # text (t-varying)
                pl.BlockSpec((B, 1, C), lambda j: (0, 0, 0)),   # img  (resident)
                pl.BlockSpec((C, C), lambda j: (0, 0)),         # wa   (resident)
                pl.BlockSpec((C, C), lambda j: (0, 0)),         # wb   (resident)
                pl.BlockSpec((1, C), lambda j: (0, 0)),         # bias (resident)
            ],
            out_specs=pl.BlockSpec((B, tm, C), lambda j: (0, j, 0)),
        ),
        compiler_params=pltpu.CompilerParams(
            dimension_semantics=("parallel",),
            vmem_limit_bytes=vmem_limit,
        ),
        cost_estimate=cost,
    )(text_bf, img3d, wa_bf16, wb_bf16, bias_f32)

    if Tp != T:
        out = out[:, :T, :]
    return out


# ----------------------------------------------------------------------------
# FCCLIPHead (forward only).  pixel_decoder / transformer_predictor are external
# submodules in the original code; here they are lightweight plain-JAX stubs.
# ----------------------------------------------------------------------------
class FCCLIPHeadPallas:
    def __init__(self, clip_embedding_dim, use_rd, num_classes,
                 pixel_decoder, transformer_predictor,
                 transformer_in_feature="multi_scale_pixel_decoder",
                 loss_weight=1.0, ignore_value=-1, key=None):
        self.clip_embedding_dim = clip_embedding_dim
        self.use_rd = use_rd
        self.num_classes = num_classes
        self.pixel_decoder = pixel_decoder
        self.predictor = transformer_predictor
        self.transformer_in_feature = transformer_in_feature
        self.loss_weight = loss_weight
        self.ignore_value = ignore_value
        self.common_stride = 4
        if use_rd:
            key = jax.random.PRNGKey(0) if key is None else key
            kw, kb = jax.random.split(key)
            c = clip_embedding_dim
            # nn.Linear(2C, C): weight (C, 2C), bias (C,)
            bound = 1.0 / (2.0 * c) ** 0.5
            self.class_embed_w = jax.random.uniform(
                kw, (c, 2 * c), jnp.float32, -bound, bound)
            self.class_embed_b = jax.random.uniform(
                kb, (c,), jnp.float32, -bound, bound)
            # Pre-split / pre-transpose / pre-cast ONCE at init (not per forward).
            self.wa_bf16 = self.class_embed_w[:, :c].T.astype(jnp.bfloat16)  # (C, C)
            self.wb_bf16 = self.class_embed_w[:, c:].T.astype(jnp.bfloat16)  # (C, C)
            self.bias_f32 = self.class_embed_b.astype(jnp.float32).reshape(1, c)

    def get_relationship_descriptor(self, text, img):
        if text.ndim == 2:
            return relationship_descriptor(
                text, img, self.wa_bf16, self.wb_bf16, self.bias_f32)
        # TODO(synk): 3-D per-image text classifier branch ('b t c, b c -> b t c')
        # is not exercised here; only the shared 2-D classifier path is implemented.
        raise NotImplementedError("3-D text classifier branch not implemented")

    def forward(self, features, mask=None):
        return self.layers(features, mask)

    def layers(self, features, mask=None):
        mask_features, transformer_encoder_features, multi_scale_features = \
            self.pixel_decoder(features)
        if self.use_rd:
            text_classifier = self.get_relationship_descriptor(
                features["text_classifier"], features["clip_embedding"])
        else:
            text_classifier = features["text_classifier"]
        if self.transformer_in_feature == "multi_scale_pixel_decoder":
            predictions = self.predictor(
                multi_scale_features, mask_features, mask,
                text_classifier=text_classifier,
                num_templates=features["num_templates"])
        else:
            raise NotImplementedError
        return predictions


# TODO(synk): pixel_decoder (MSDeformAttn pixel decoder) and transformer_predictor
# (mask transformer decoder) are externally-built nn.Modules passed into __init__;
# they are represented here by minimal plain-JAX passthrough stubs.
def _stub_pixel_decoder(features):
    feats = [features[k] for k in ("res2", "res3", "res4", "res5")]
    mask_features = feats[0]                 # NCHW passthrough
    transformer_encoder_features = feats[-1]
    multi_scale_features = feats[1:]
    return mask_features, transformer_encoder_features, multi_scale_features


def _stub_predictor(multi_scale_features, mask_features, mask,
                    *, text_classifier, num_templates):
    return {
        "pred_logits": text_classifier,      # (B, T, C) rd classifier from the kernel
        "pred_masks": mask_features,
        "num_templates": num_templates,
    }


# ----------------------------------------------------------------------------
# main
# ----------------------------------------------------------------------------
if __name__ == "__main__":
    B, T, C = 2, 256, 128        # batch, #text classes, clip_embedding_dim (lane-dense C)
    H = W = 16

    key = jax.random.PRNGKey(0)
    k_text, k_img, k_f2, k_f3, k_f4, k_f5, k_head = jax.random.split(key, 7)

    features = {
        "res2": jax.random.normal(k_f2, (B, 4, H, W), jnp.float32),
        "res3": jax.random.normal(k_f3, (B, 4, H // 2, W // 2), jnp.float32),
        "res4": jax.random.normal(k_f4, (B, 4, H // 4, W // 4), jnp.float32),
        "res5": jax.random.normal(k_f5, (B, 4, H // 8, W // 8), jnp.float32),
        "text_classifier": jax.random.normal(k_text, (T, C), jnp.float32),
        "clip_embedding": jax.random.normal(k_img, (B, C), jnp.float32),
        "num_templates": jnp.array([T], jnp.int32),
    }

    head = FCCLIPHeadPallas(
        clip_embedding_dim=C, use_rd=True, num_classes=T,
        pixel_decoder=_stub_pixel_decoder,
        transformer_predictor=_stub_predictor,
        key=k_head,
    )

    preds = head.forward(features)
    rd_kernel = jax.block_until_ready(preds["pred_logits"])

    text = features["text_classifier"]
    img = features["clip_embedding"]
    W_full = head.class_embed_w
    b_full = head.class_embed_b
    hi = jax.lax.Precision.HIGHEST

    # (a) Reference matching the kernel's bf16-operand / f32-accumulate MXU path
    #     (both halves of the fused concat+Linear now use bf16 weights).
    text_bf = text.astype(jnp.bfloat16)
    img_bf = img.astype(jnp.bfloat16)
    rd_bf = (text_bf[None, :, :] * img_bf[:, None, :]).astype(jnp.float32)
    k_ref = jnp.dot(text_bf.astype(jnp.float32),
                    head.wb_bf16.astype(jnp.float32), precision=hi) + b_full
    ref_bf16path = jnp.einsum("btc,cd->btd", rd_bf,
                              head.wa_bf16.astype(jnp.float32),
                              precision=hi) + k_ref[None]

    # (b) Full-f32 PyTorch-semantics reference (einsum + concat + Linear + .float()).
    rd_f32 = text[None, :, :] * img[:, None, :]
    x = jnp.concatenate([rd_f32, jnp.broadcast_to(text, (B, T, C))], axis=-1)
    ref_f32 = jnp.einsum("btk,ck->btc", x, W_full, precision=hi) + b_full

    assert rd_kernel.shape == (B, T, C) and rd_kernel.dtype == jnp.float32
    assert jnp.allclose(rd_kernel, ref_bf16path, atol=2e-3, rtol=2e-3), \
        float(jnp.max(jnp.abs(rd_kernel - ref_bf16path)))
    # Loose tolerance vs. pure-f32 reference: bf16 MXU operands (std FC-CLIP precision).
    assert jnp.allclose(rd_kernel, ref_f32, atol=6e-2, rtol=6e-2), \
        float(jnp.max(jnp.abs(rd_kernel - ref_f32)))
    print("KERNEL_OK")
</pallas_src>

<mosaic_0001>
module attributes {stable_mosaic.version = 11 : i64} {
  func.func @_rd_class_embed_kernel(%arg0: i32, %arg1: memref<128x128xbf16, #tpu.memory_space<vmem>>, %arg2: memref<2x1x128xbf16, #tpu.memory_space<vmem>>, %arg3: memref<128x128xbf16, #tpu.memory_space<vmem>>, %arg4: memref<128x128xbf16, #tpu.memory_space<vmem>>, %arg5: memref<1x128xf32, #tpu.memory_space<vmem>>, %arg6: memref<2x128x128xf32, #tpu.memory_space<vmem>>) attributes {dimension_semantics = [#tpu.dimension_semantics<parallel>], iteration_bounds = array<i64: 2>, scalar_prefetch = 0 : i64, scratch_operands = 0 : i64, tpu.core_type = #tpu.core_type<tc>, window_params = [{transform_indices = @transform_0, window_bounds = array<i64: 128, 128>}, {pipeline_mode = #tpu.pipeline_mode<synchronous>, transform_indices = @transform_1, window_bounds = array<i64: 2, 1, 128>}, {pipeline_mode = #tpu.pipeline_mode<synchronous>, transform_indices = @transform_2, window_bounds = array<i64: 128, 128>}, {pipeline_mode = #tpu.pipeline_mode<synchronous>, transform_indices = @transform_3, window_bounds = array<i64: 128, 128>}, {pipeline_mode = #tpu.pipeline_mode<synchronous>, transform_indices = @transform_4, window_bounds = array<i64: 1, 128>}, {transform_indices = @transform_5, window_bounds = array<i64: 2, 128, 128>}]} {
    %c0 = arith.constant 0 : index
    %c0_0 = arith.constant 0 : index
    %0 = vector.load %arg1[%c0, %c0_0] : memref<128x128xbf16, #tpu.memory_space<vmem>>, vector<128x128xbf16>
    %c0_1 = arith.constant 0 : index
    %c0_2 = arith.constant 0 : index
    %1 = vector.load %arg4[%c0_1, %c0_2] : memref<128x128xbf16, #tpu.memory_space<vmem>>, vector<128x128xbf16>
    %cst = arith.constant dense<0.000000e+00> : vector<128x128xf32>
    %2 = tpu.matmul %0, %1, %cst {dimension_numbers = #tpu.dot_dimension_numbers<[1], [0], [0], [1], [0, 0, 1, 1], [], []>} : vector<128x128xbf16>, vector<128x128xbf16>, vector<128x128xf32> -> vector<128x128xf32>
    %c0_3 = arith.constant 0 : index
    %c0_4 = arith.constant 0 : index
    %3 = vector.load %arg5[%c0_3, %c0_4] : memref<1x128xf32, #tpu.memory_space<vmem>>, vector<1x128xf32>
    %4 = vector.broadcast %3 : vector<1x128xf32> to vector<128x128xf32>
    %5 = arith.addf %2, %4 : vector<128x128xf32>
    %c0_5 = arith.constant 0 : index
    %c0_6 = arith.constant 0 : index
    %6 = vector.load %arg3[%c0_5, %c0_6] : memref<128x128xbf16, #tpu.memory_space<vmem>>, vector<128x128xbf16>
    %c0_7 = arith.constant 0 : index
    %c0_8 = arith.constant 0 : index
    %c0_9 = arith.constant 0 : index
    %7 = vector.load %arg2[%c0_7, %c0_8, %c0_9] : memref<2x1x128xbf16, #tpu.memory_space<vmem>>, vector<1x1x128xbf16>
    %8 = vector.shape_cast %7 : vector<1x1x128xbf16> to vector<1x128xbf16>
    %9 = vector.broadcast %8 : vector<1x128xbf16> to vector<128x128xbf16>
    %10 = arith.mulf %0, %9 : vector<128x128xbf16>
    %cst_10 = arith.constant dense<0.000000e+00> : vector<128x128xf32>
    %11 = tpu.matmul %10, %6, %cst_10 {dimension_numbers = #tpu.dot_dimension_numbers<[1], [0], [0], [1], [0, 0, 1, 1], [], []>} : vector<128x128xbf16>, vector<128x128xbf16>, vector<128x128xf32> -> vector<128x128xf32>
    %12 = arith.addf %11, %5 : vector<128x128xf32>
    %c0_11 = arith.constant 0 : index
    %c0_12 = arith.constant 0 : index
    %c0_13 = arith.constant 0 : index
    %13 = vector.load %arg6[%c0_11, %c0_12, %c0_13] : memref<2x128x128xf32, #tpu.memory_space<vmem>>, vector<1x128x128xf32>
    %14 = vector.shape_cast %13 : vector<1x128x128xf32> to vector<128x128xf32>
    %15 = vector.shape_cast %12 : vector<128x128xf32> to vector<1x128x128xf32>
    tpu.vector_store %arg6[%c0_11, %c0_12, %c0_13], %15 {strides = array<i32>} : memref<2x128x128xf32, #tpu.memory_space<vmem>>, vector<1x128x128xf32>,
    %c1 = arith.constant 1 : index
    %c0_14 = arith.constant 0 : index
    %c0_15 = arith.constant 0 : index
    %16 = vector.load %arg2[%c1, %c0_14, %c0_15] : memref<2x1x128xbf16, #tpu.memory_space<vmem>>, vector<1x1x128xbf16>
    %17 = vector.shape_cast %16 : vector<1x1x128xbf16> to vector<1x128xbf16>
    %18 = vector.broadcast %17 : vector<1x128xbf16> to vector<128x128xbf16>
    %19 = arith.mulf %0, %18 : vector<128x128xbf16>
    %cst_16 = arith.constant dense<0.000000e+00> : vector<128x128xf32>
    %20 = tpu.matmul %19, %6, %cst_16 {dimension_numbers = #tpu.dot_dimension_numbers<[1], [0], [0], [1], [0, 0, 1, 1], [], []>} : vector<128x128xbf16>, vector<128x128xbf16>, vector<128x128xf32> -> vector<128x128xf32>
    %21 = arith.addf %20, %5 : vector<128x128xf32>
    %c1_17 = arith.constant 1 : index
    %c0_18 = arith.constant 0 : index
    %c0_19 = arith.constant 0 : index
    %22 = vector.load %arg6[%c1_17, %c0_18, %c0_19] : memref<2x128x128xf32, #tpu.memory_space<vmem>>, vector<1x128x128xf32>
    %23 = vector.shape_cast %22 : vector<1x128x128xf32> to vector<128x128xf32>
    %24 = vector.shape_cast %21 : vector<128x128xf32> to vector<1x128x128xf32>
    tpu.vector_store %arg6[%c1_17, %c0_18, %c0_19], %24 {strides = array<i32>} : memref<2x128x128xf32, #tpu.memory_space<vmem>>, vector<1x128x128xf32>,
    return
  }
  func.func @transform_0(%arg0: i32) -> (i32, i32) {
    %c0_i32 = arith.constant 0 : i32
    %c0_i32_0 = arith.constant 0 : i32
    return %arg0, %c0_i32 : i32, i32
  }
  func.func @transform_1(%arg0: i32) -> (i32, i32, i32) {
    %c0_i32 = arith.constant 0 : i32
    %c0_i32_0 = arith.constant 0 : i32
    %c0_i32_1 = arith.constant 0 : i32
    %c0_i32_2 = arith.constant 0 : i32
    return %c0_i32, %c0_i32_0, %c0_i32_1 : i32, i32, i32
  }
  func.func @transform_2(%arg0: i32) -> (i32, i32) {
    %c0_i32 = arith.constant 0 : i32
    %c0_i32_0 = arith.constant 0 : i32
    %c0_i32_1 = arith.constant 0 : i32
    return %c0_i32, %c0_i32_0 : i32, i32
  }
  func.func @transform_3(%arg0: i32) -> (i32, i32) {
    %c0_i32 = arith.constant 0 : i32
    %c0_i32_0 = arith.constant 0 : i32
    %c0_i32_1 = arith.constant 0 : i32
    return %c0_i32, %c0_i32_0 : i32, i32
  }
  func.func @transform_4(%arg0: i32) -> (i32, i32) {
    %c0_i32 = arith.constant 0 : i32
    %c0_i32_0 = arith.constant 0 : i32
    %c0_i32_1 = arith.constant 0 : i32
    return %c0_i32, %c0_i32_0 : i32, i32
  }
  func.func @transform_5(%arg0: i32) -> (i32, i32, i32) {
    %c0_i32 = arith.constant 0 : i32
    %c0_i32_0 = arith.constant 0 : i32
    %c0_i32_1 = arith.constant 0 : i32
    return %c0_i32, %arg0, %c0_i32_0 : i32, i32, i32
  }
}

</mosaic_0001>

<bundles_post_ra>
// kernel: tpu_custom_call.1
= control target key start
LH: loop header
LB: loop body
LE: loop exit
PB: predicated region body
PF: predicated region fallthrough
CT: control target
= control target key end

     0   :  { %10 = vsyncpa [#allocation3], 0  ;;  %s2106_s0 = inlined_call_operand.hbm [shape: bf16[256,128], index: 0, kind: input, shape index: {}]   ;;  %s2107_s1 = inlined_call_operand.vmem [shape: bf16[2,1,128], index: 1, kind: input, shape index: {}]   ;;  %s2108_s2 = inlined_call_operand.hbm [shape: bf16[128,128], index: 2, kind: input, shape index: {}]   ;;  %s2109_s3 = inlined_call_operand.hbm [shape: bf16[128,128], index: 3, kind: input, shape index: {}]   ;;  %s2110_s4 = inlined_call_operand.vmem [shape: f32[1,128], index: 4, kind: input, shape index: {}]   ;;  %s2111_s5 = inlined_call_operand.hbm [shape: f32[2,256,128], index: 5, kind: output, shape index: {}]  }
   0x1   :  { %12 = vsyncpa [#allocation3 + $0x1], 0 }
   0x2   :  { %13 = vsyncpa [#allocation6], 0 }
   0x3   :  { %14 = vsyncpa [#allocation4], 0 }
   0x4   :  { %16 = vsyncpa [#allocation4 + $0x1], 0  ;;  %s1604_s18 = smov 0   ;;  %s1606_s19 = smov 0  }
   0x5   :  { %s1608_s20 = smov 0   ;;  %s1610_s21 = smov 0  }
   0x6 LB: > { %s1625_s22 = sadd.s32 4294967295, %s1560_s21   ;;  %s1086_s23 = sadd.s32 4294967294, %s1560_s21   ;;  %s1560_s21 = sphi %s1610_s21, %s2131_s21   ;;  %s1556_s20 = sphi %s1608_s20, %s2130_s20   ;;  %s1552_s19 = sphi %s1606_s19, %s2129_s19   ;;  %s1548_s18 = sphi %s1604_s18, %s2128_s18  }
   0x7   : > { %p42_p0 = scmp.ne.s32.totalorder %s1552_s19, %s1548_s18  ;;  %p2112_p1 = scmp.eq.s32.totalorder %s1625_s22, 0 }
   0x8   : > { %p156_p3 = scmp.eq.s32.totalorder %s1086_s23, 1  ;;  %p1087_p5 = scmp.ge.s32.totalorder %s1560_s21, 1 }
   0x9   : > { %p1634_p4 = por %p2112_p1, %p42_p0  ;;  %p163_p7 = scmp.lt.s32.totalorder %s1560_s21, 3 }
   0xa   : > { %p1639_p6 = por %p156_p3, %p42_p0  ;;  %s1562_s27 = smov [#allocation5]  }
   0xb   : > { %s2115_s24 = scalar_select %p1634_p4, 1, 0 }
   0xc   : > { %s2116_s25 = scalar_select %p1639_p6, 1, 0 }
   0xd   : > { %p1644_p8 = pnand %p1087_p5, %p163_p7  ;;  %s178_s28 = sshll.u32 %s1562_s27, 4  ;;  %s1648_s28 = int_to_ptr.vmem [resolvable:$true] %s178_s28 }
   0xe   : > { %s1563_s30 = smov [#allocation7]   ;;  %s1432_s9 = scalar_lea.hbm %s2108_s2, 1024 }
   0xf   : > { %p1344_p9 = pneg %p1644_p8  ;;  %s191_s6 = sshll.u32 %s1563_s30, 4  ;;  %s1659_s6 = int_to_ptr.vmem [resolvable:$true] %s191_s6 }
  0x10   : > { %p1433_p12 = scmp.ne.s32.totalorder %s2108_s2, %s1432_s9  ;;  %p1439_p5 = scmp.lt.u32.totalorder %s1432_s9, %s2108_s2 }
  0x11   : > { %p1655_p11 = pnand %p1344_p9, %p2112_p1 }
  0x13   : > { %p1434_p13 = pneg %p1655_p11 }
  0x15   : > { %p1435_p0 = pnand %p1434_p13, %p1433_p12 }
  0x17   : > { %p1436_p3 = pneg %p1435_p0 }
  0x19   : > { %p1441_p7 = pnand %p1439_p5, %p1436_p3 }
  0x1b   : > { %1444 = shalt.err (!%p1441_p7)
}
  0x1c   : > { %s1445_s14 = scalar_lea.vmem %s1648_s28, 1024  ;;  %p1453_p2 = scmp.lt.s32.totalorder %s1648_s28, %s1648_s28 }
  0x1d   : > { %p1446_p9 = scmp.ne.s32.totalorder %s1648_s28, %s1445_s14  ;;  %p1454_p12 = scmp.lt.s32.totalorder %s1445_s14, %s1445_s14 }
  0x1f   : > { %p1448_p10 = pnand %p1446_p9, %p1434_p13  ;;  %p1455_p0 = por %p1454_p12, %p1453_p2 }
  0x21   : > { %p1449_p1 = pneg %p1448_p10 }
  0x23   : > { %p1456_p6 = pnand %p1455_p0, %p1449_p1 }
  0x25   : > { %1459 = shalt.err (!%p1456_p6)
}
  0x26   : > { %s1564_s15 = smov 64   ;;  %s1565_s16 = smov 4  }
  0x27   : > { %1347 = dma.hbm_to_vmem [thread:$0]  (!%p1655_p11), %s2108_s2, 1024, %s1648_s28, [#allocation6], %s1564_s15, %s1564_s15, %s1565_s16  }
  0x28   : > { %s1460_s7 = scalar_lea.hbm %s2109_s3, 1024 }
  0x29   : > { %p1461_p1 = scmp.ne.s32.totalorder %s2109_s3, %s1460_s7  ;;  %p1467_p10 = scmp.lt.u32.totalorder %s1460_s7, %s2109_s3 }
  0x2b   : > { %p1463_p2 = pnand %p1461_p1, %p1434_p13 }
  0x2d   : > { %p1464_p6 = pneg %p1463_p2 }
  0x2f   : > { %p1469_p3 = pnand %p1467_p10, %p1464_p6 }
  0x31   : > { %1472 = shalt.err (!%p1469_p3)
}
  0x32   : > { %s1473_s28 = scalar_lea.vmem %s1659_s6, 1024  ;;  %p1481_p12 = scmp.lt.s32.totalorder %s1659_s6, %s1659_s6 }
  0x33   : > { %p1474_p5 = scmp.ne.s32.totalorder %s1659_s6, %s1473_s28  ;;  %p1482_p0 = scmp.lt.s32.totalorder %s1473_s28, %s1473_s28 }
  0x35   : > { %p1476_p7 = pnand %p1474_p5, %p1434_p13  ;;  %p1483_p1 = por %p1482_p0, %p1481_p12 }
  0x37   : > { %p1477_p9 = pneg %p1476_p7 }
  0x39   : > { %p1484_p2 = pnand %p1483_p1, %p1477_p9 }
  0x3b   : > { %1487 = shalt.err (!%p1484_p2)
}
  0x3c   : > { %1350 = dma.hbm_to_vmem [thread:$0]  (!%p1655_p11), %s2109_s3, 1024, %s1659_s6, [#allocation6], %s1564_s15, %s1564_s15, %s1565_s16  }
  0x3d   : > { %s1720_s29 = sadd.s32 1, %s1560_s21   ;;  %s29_s14 = sadd.s32 1, %s1556_s20 }
  0x3e   : > { %s26_s17 = ssub.s32 %s1560_s21, %s1720_s29  ;;  %p36_p13 = scmp.ne.s32.totalorder %s1556_s20, %s1552_s19 }
  0x3f   : > { %p27_p6 = scmp.eq.s32.totalorder %s26_s17, 0  ;;  %p37_p10 = scmp.eq.s32.totalorder %s1560_s21, 0 }
  0x40   : > { %p2119_p3 = scmp.eq.s32.totalorder %s1625_s22, 1  ;;  %p1361_p7 = scmp.lt.s32.totalorder %s1560_s21, 2 }
  0x41   : > { %s1736_s27 = scalar_select %p27_p6, %s1556_s20, %s29_s14  }
  0x42   : > { %p1730_p5 = por %p2119_p3, %p36_p13  ;;  %p38_p9 = por %p37_p10, %p36_p13 }
  0x43   : > { %s208_s30 = sand.u32 1, %s1556_s20   ;;  %s1164_s6 = sshll.u32 %s1560_s21, 10 }
  0x44   : > { %s2120_s23 = scalar_select %p1730_p5, 1, 0 }
  0x45   : > { %s1091_s7 = sshll.u32 %s208_s30, 6  ;;  %s1743_s10 = scalar_lea.hbm %s2106_s0, %s1164_s6 }
  0x46   : > { %s212_s11 = scalar_lea.vmem [#allocation2], %s1091_s7  ;;  %p1747_p11 = pnand %p1361_p7, %p38_p9 }
  0x47   : > { %s219_s28 = sshll.u32 %s212_s11, 4  ;;  %s1751_s13 = scalar_lea.sflag [#allocation3], %s208_s30  ;;  %s1745_s28 = int_to_ptr.vmem [resolvable:$true] %s219_s28 }
  0x48   : > { %s1488_s14 = scalar_lea.hbm %s1743_s10, 1024  ;;  %p1490_p0 = pneg %p1747_p11 }
  0x49   : > { %p1489_p12 = scmp.ne.s32.totalorder %s1743_s10, %s1488_s14  ;;  %s1493_s6 = scalar_lea.hbm %s2106_s0, 2048 }
  0x4a   : > { %p1494_p13 = scmp.lt.u32.totalorder %s1743_s10, %s2106_s0  ;;  %p1495_p6 = scmp.lt.u32.totalorder %s1493_s6, %s1488_s14 }
  0x4b   : > { %p1491_p1 = pnand %p1490_p0, %p1489_p12  ;;  %p1497_p3 = scmp.lt.u32.totalorder %s1488_s14, %s1743_s10 }
  0x4c   : > { %p1496_p10 = por %p1495_p6, %p1494_p13 }
  0x4d   : > { %p1492_p2 = pneg %p1491_p1 }
  0x4e   : > { %p1498_p7 = por %p1497_p3, %p1496_p10 }
  0x50   : > { %p1499_p9 = pnand %p1498_p7, %p1492_p2 }
  0x52   : > { %1502 = shalt.err (!%p1499_p9)
}
  0x53   : > { %s1503_s30 = scalar_lea.vmem %s1745_s28, 1024  ;;  %s1566_s11 = smov [#allocation2]  }
  0x54   : > { %p1504_p12 = scmp.ne.s32.totalorder %s1745_s28, %s1503_s30  ;;  %s1508_s17 = sshll.u32 %s1566_s11, 4  ;;  %s1509_s17 = int_to_ptr.vmem [resolvable:$false] %s1508_s17 }
  0x55   : > { %s1510_s7 = scalar_lea.vmem %s1509_s17, 2048  ;;  %p1511_p4 = scmp.lt.s32.totalorder %s1745_s28, %s1509_s17 }
  0x56   : > { %p1506_p1 = pnand %p1504_p12, %p1490_p0  ;;  %p1512_p13 = scmp.lt.s32.totalorder %s1510_s7, %s1503_s30 }
  0x58   : > { %p1507_p5 = pneg %p1506_p1  ;;  %p1513_p6 = por %p1512_p13, %p1511_p4 }
  0x5a   : > { %p1514_p10 = pnand %p1513_p6, %p1507_p5 }
  0x5c   : > { %1517 = shalt.err (!%p1514_p10)
}
  0x5d   : > { %1354 = dma.hbm_to_vmem [thread:$0]  (!%p1747_p11), %s1743_s10, 1024, %s1745_s28, %s1751_s13, %s1564_s15, %s1564_s15, %s1565_s16  }
  0x5e   : > { %231 = sbr.rel (%p1644_p8) target bundleno = 408 (0x198), region = 40  ;;  %s1785_s14 = sand.u32 (!%p1644_p8), 1, %s1552_s19  }
  0x5f   : > { %s1095_s6 = sshll.u32 (!%p1644_p8), %s1785_s14, 6  ;;  %s234_s8 = scalar_lea.sflag (!%p1644_p8), [#allocation3], %s1785_s14 }
  0x60   : > { %s1789_s9 = scalar_lea.vmem (!%p1644_p8), [#allocation2], %s1095_s6  ;;  %p2122_p4 = scmp.ne.s32.totalorder (!%p1644_p8), %s2115_s24, 0 }
  0x65   : > { %1535 = dma.done.wait (%p2122_p4), %s234_s8, 1024  }
  0x66   : > { %1537 = vsyncadd (%p2122_p4), %s234_s8, 4294966272  ;;  %p2123_p5 = scmp.eq.s32.totalorder %s1625_s22, 0 }
  0x68   : > { %1539 = dma.done.wait (%p2123_p5), [#allocation6], 2048   ;;  %p2124_p8 = pmov %p2123_p5 }
  0x69   : > { %v1408_v0 = vld [vmem:[#allocation7] sm:$0xff]   ;;  %v1410_v2 = vld [vmem:[#allocation7 + $0x8] sm:$0xff]   ;;  %v1412_v4 = vld [vmem:[#allocation7 + $0x10] sm:$0xff]   ;;  %v527_v7 = vlaneseq  ;;  %s1098_s12 = sshll.u32 %s1785_s14, 8  ;;  %s952_s30 = scalar_lea.sflag [#allocation4], %s1785_s14 }
  0x6a   : > { %1541 = vsyncadd (%p2124_p8), [#allocation6], 4294965248  ;;  %v1799_v1 = vld [vmem:[#allocation5] sm:$0xff]   ;;  %1214 = vmatprep.subr.bf16.mxu0 %v1408_v0  ;;  %v1802_v3 = vld [vmem:[#allocation5 + $0x8] sm:$0xff]   ;;  %s2000_s13 = scalar_lea.vmem [#allocation8], %s1098_s12 }
  0x6b   : > { %1246 = vmatprep.subr.bf16.mxu1 %v1799_v1  ;;  %1215 = vmatpush3.bf16.msra.mxu0 %v1408_v0  ;;  %v1806_v5 = vld [vmem:[#allocation5 + $0x10] sm:$0xff]   ;;  %v1414_v6 = vld [vmem:[#allocation7 + $0x18] sm:$0xff]   ;;  %v1416_v9 = vld [vmem:[#allocation7 + $0x20] sm:$0xff]   ;;  %v1813_v10 = vshrl.u32 %v527_v7, 7 }
  0x6c   : > { %1247 = vmatpush3.bf16.msra.mxu1 %v1799_v1  ;;  %1216 = vmatprep.subr.bf16.mxu0 %v1410_v2  ;;  %v1810_v8 = vld [vmem:[#allocation5 + $0x18] sm:$0xff]   ;;  %v1816_v11 = vld [vmem:[#allocation5 + $0x20] sm:$0xff]   ;;  %v1418_v12 = vld [vmem:[#allocation7 + $0x28] sm:$0xff]  }
  0x6d   : > { %1248 = vmatprep.subr.bf16.mxu1 %v1802_v3  ;;  %v1820_v13 = vld [vmem:[%s1789_s9] sm:$0xf]  ;;  %v1823_v14 = vld [vmem:[%s1789_s9 + $0x4] sm:$0xf]  ;;  %v529_v15 = vsub.s32 0, %v1813_v10  ;;  %v1827_v16 = vld [vmem:[#allocation5 + $0x28] sm:$0xff]  }
  0x6e   : > { %v1100_v17 = vcombine.low %v1820_v13, %v1823_v14  ;;  %v523_v18 = vld [vmem:[%s2107_s1] sm:$0x1]  ;;  %v1420_v20 = vld [vmem:[#allocation7 + $0x30] sm:$0xff]   ;;  %v1422_v24 = vld [vmem:[#allocation7 + $0x38] sm:$0xff]  }
  0x6f   : > { %1217 = vmatpush3.bf16.msra.mxu0 %v1410_v2  ;;  %v525_v19 = vpack.i.b16 %v523_v18, %v523_v18  ;;  %v1838_v22 = vld [vmem:[#allocation5 + $0x30] sm:$0xff]   ;;  %v1848_v27 = vld [vmem:[%s1789_s9 + $0x8] sm:$0xf]  ;;  %v1851_v28 = vld [vmem:[%s1789_s9 + $0xc] sm:$0xf] }
  0x70   : > { %1249 = vmatpush3.bf16.msra.mxu1 %v1802_v3  ;;  %1218 = vmatprep.subr.bf16.mxu0 %v1412_v4  ;;  %v1854_v29 = vld [vmem:[#allocation5 + $0x38] sm:$0xff]   ;;  %v1861_v33 = vld [vmem:[%s1789_s9 + $0x10] sm:$0xf]  ;;  %v1864_v34 = vld [vmem:[%s1789_s9 + $0x14] sm:$0xf]  ;;  %v1101_v35 = vcombine.low %v1848_v27, %v1851_v28 }
  0x71   : > { %1250 = vmatprep.subr.bf16.mxu1 %v1806_v5  ;;  %1230 = vmatprep.mubr.bf16.mxu0 %v1100_v17  ;;  %v530_v21 = vrot.slane %v525_v19, %v529_v15  ;;  %v1877_v39 = vld [vmem:[%s1789_s9 + $0x18] sm:$0xf]  ;;  %v1880_v40 = vld [vmem:[%s1789_s9 + $0x1c] sm:$0xf]  ;;  %v1102_v41 = vcombine.low %v1861_v33, %v1864_v34  ;;  %v1891_v45 = vld [vmem:[%s1789_s9 + $0x20] sm:$0xf] }
  0x72   : > { %v1894_v46 = vld [vmem:[%s1789_s9 + $0x24] sm:$0xf]  ;;  %v1133_v47 = vld [vmem:[%s2107_s1 + $0x1] sm:$0x1]  ;;  %v1103_v48 = vcombine.low %v1877_v39, %v1880_v40  ;;  %v1912_v52 = vld [vmem:[%s1789_s9 + $0x28] sm:$0xf] }
  0x73   : > { %1219 = vmatpush3.bf16.msra.mxu0 %v1412_v4  ;;  %v1840_v23 = vcombine.low %v530_v21, %v530_v21  ;;  %v1915_v53 = vld [vmem:[%s1789_s9 + $0x2c] sm:$0xf]  ;;  %v763_v54 = vpack.i.b16 %v1133_v47, %v1133_v47  ;;  %v1104_v55 = vcombine.low %v1891_v45, %v1894_v46  ;;  %v1926_v59 = vld [vmem:[%s1789_s9 + $0x30] sm:$0xf]  ;;  %v1929_v60 = vld [vmem:[%s1789_s9 + $0x34] sm:$0xf] }
  0x74   : > { %1251 = vmatpush3.bf16.msra.mxu1 %v1806_v5  ;;  %1220 = vmatprep.subr.bf16.mxu0 %v1414_v6  ;;  %v1105_v62 = vcombine.low %v1912_v52, %v1915_v53  ;;  %v289_v2 = vld [vmem:[%s1789_s9 + $0x38] sm:$0xf] }
  0x75   : > { %1252 = vmatprep.subr.bf16.mxu1 %v1810_v8  ;;  %v535_v25 = vmul.bf16 %v1840_v23, %v1820_v13  ;;  %v536_v26 = vmul.bf16 %v1840_v23, %v1823_v14  ;;  %v537_v31 = vmul.bf16 %v1840_v23, %v1848_v27  ;;  %v538_v32 = vmul.bf16 %v1840_v23, %v1851_v28 }
  0x76   : > { %v539_v36 = vmul.bf16 %v1840_v23, %v1861_v33  ;;  %v540_v37 = vmul.bf16 %v1840_v23, %v1864_v34  ;;  %v541_v43 = vmul.bf16 %v1840_v23, %v1877_v39  ;;  %v542_v44 = vmul.bf16 %v1840_v23, %v1880_v40 }
  0x77   : > { %1221 = vmatpush3.bf16.msra.mxu0 %v1414_v6  ;;  %v1117_v30 = vcombine.low %v535_v25, %v536_v26  ;;  %v1118_v38 = vcombine.low %v537_v31, %v538_v32  ;;  %v543_v49 = vmul.bf16 %v1840_v23, %v1891_v45  ;;  %v544_v50 = vmul.bf16 %v1840_v23, %v1894_v46 }
  0x78   : > { %1253 = vmatpush3.bf16.msra.mxu1 %v1810_v8  ;;  %1222 = vmatprep.subr.bf16.mxu0 %v1416_v9  ;;  %v1119_v42 = vcombine.low %v539_v36, %v540_v37  ;;  %v1120_v51 = vcombine.low %v541_v43, %v542_v44  ;;  %v545_v57 = vmul.bf16 %v1840_v23, %v1912_v52  ;;  %v1983_v36 = vld [vmem:[%s2110_s4] ss:$0 sm:$0xff] }
  0x79   : > { %1254 = vmatprep.subr.bf16.mxu1 %v1816_v11  ;;  %1262 = vmatprep.mubr.bf16.mxu1 %v1117_v30  ;;  %v1121_v56 = vcombine.low %v543_v49, %v544_v50  ;;  %v546_v58 = vmul.bf16 %v1840_v23, %v1915_v53  ;;  %v768_v61 = vrot.slane %v763_v54, %v529_v15 }
  0x7a   : > { %v547_v63 = vmul.bf16 %v1840_v23, %v1926_v59  ;;  %v548_v0 = vmul.bf16 %v1840_v23, %v1929_v60  ;;  %v549_v7 = vmul.bf16 %v1840_v23, %v289_v2 }
  0x7b   : > { %1223 = vmatpush3.bf16.msra.mxu0 %v1416_v9  ;;  %v1134_v4 = vcombine.low %v768_v61, %v768_v61 }
  0x7c   : > { %1255 = vmatpush3.bf16.msra.mxu1 %v1816_v11  ;;  %1224 = vmatprep.subr.bf16.mxu0 %v1418_v12  ;;  %v1123_v6 = vcombine.low %v547_v63, %v548_v0 }
  0x7d   : > { %1256 = vmatprep.subr.bf16.mxu1 %v1827_v16  ;;  %v774_v10 = vmul.bf16 %v1134_v4, %v1823_v14  ;;  %v781_v15 = vmul.bf16 %v1134_v4, %v1891_v45  ;;  %v782_v17 = vmul.bf16 %v1134_v4, %v1894_v46  ;;  %v776_v14 = vmul.bf16 %v1134_v4, %v1851_v28 }
  0x7e   : > { %v783_v19 = vmul.bf16 %v1134_v4, %v1912_v52  ;;  %v784_v21 = vmul.bf16 %v1134_v4, %v1915_v53  ;;  %v786_v25 = vmul.bf16 %v1134_v4, %v1929_v60  ;;  %v780_v31 = vmul.bf16 %v1134_v4, %v1880_v40 }
  0x7f   : > { %1225 = vmatpush3.bf16.msra.mxu0 %v1418_v12  ;;  %v787_v32 = vmul.bf16 %v1134_v4, %v289_v2 }
  0x80   : > { %1257 = vmatpush3.bf16.msra.mxu1 %v1827_v16  ;;  %1226 = vmatprep.subr.bf16.mxu0 %v1420_v20 }
  0x81   : > { %1258 = vmatprep.subr.bf16.mxu1 %v1838_v22 }
  0x83   : > { %1227 = vmatpush3.bf16.msra.mxu0 %v1420_v20  ;;  %v1139_v20 = vcombine.low %v781_v15, %v782_v17 }
  0x84   : > { %1259 = vmatpush3.bf16.msra.mxu1 %v1838_v22  ;;  %1228 = vmatprep.subr.bf16.mxu0 %v1422_v24 }
  0x85   : > { %1260 = vmatprep.subr.bf16.mxu1 %v1854_v29 }
  0x87   : > { %1229 = vmatpush3.bf16.msra.mxu0 %v1422_v24  ;;  %v785_v24 = vmul.bf16 %v1134_v4, %v1926_v59 }
  0x88   : > { %1261 = vmatpush3.bf16.msra.mxu1 %v1854_v29  ;;  %1278 = vmatprep.subr.bf16.mxu0 %v1799_v1 }
  0x89   : > { %1310 = vmatprep.subr.bf16.mxu1 %v1799_v1  ;;  %v1141_v30 = vcombine.low %v785_v24, %v786_v25 }
  0x8a   : > { %1231 = vmatmul.mubr.bf16.vlgmr.msra.gmra.mrb[0].mxu0 %v1101_v35 }
  0x8b   : > { %1263 = vmatmul.mubr.bf16.vlgmr.msra.gmra.mrb[0].mxu1 %v1118_v38  ;;  %1279 = vmatpush3.bf16.msra.mxu0 %v1799_v1 }
  0x8c   : > { %1318 = vmatpush3.bf16.msra.mxu1 %v1799_v1  ;;  %1280 = vmatprep.subr.bf16.mxu0 %v1802_v3  ;;  %v1122_v1 = vcombine.low %v545_v57, %v546_v58 }
  0x8d   : > { %1311 = vmatprep.subr.bf16.mxu1 %v1802_v3  ;;  %1234 = vmatprep.mubr.bf16.mxu0 %v1102_v41 }
  0x8e   : > { %1266 = vmatprep.mubr.bf16.mxu1 %v1119_v42 }
  0x8f   : > { %1281 = vmatpush3.bf16.msra.mxu0 %v1802_v3 }
  0x90   : > { %1319 = vmatpush3.bf16.msra.mxu1 %v1802_v3  ;;  %1282 = vmatprep.subr.bf16.mxu0 %v1806_v5  ;;  %v290_v3 = vld [vmem:[%s1789_s9 + $0x3c] sm:$0xf] }
  0x91   : > { %1312 = vmatprep.subr.bf16.mxu1 %v1806_v5  ;;  %v550_v9 = vmul.bf16 %v1840_v23, %v290_v3  ;;  %v1107_v12 = vcombine.low %v289_v2, %v290_v3  ;;  %v778_v23 = vmul.bf16 %v1134_v4, %v1864_v34 }
  0x92   : > { %1235 = vmatmul.mubr.bf16.gmra.mrb[4].mxu0 %v1103_v48 }
  0x93   : > { %1267 = vmatmul.mubr.bf16.gmra.mrb[4].mxu1 %v1120_v51  ;;  %1283 = vmatpush3.bf16.msra.mxu0 %v1806_v5  ;;  %v1124_v18 = vcombine.low %v549_v7, %v550_v9 }
  0x94   : > { %1320 = vmatpush3.bf16.msra.mxu1 %v1806_v5  ;;  %1284 = vmatprep.subr.bf16.mxu0 %v1810_v8  ;;  %v1106_v5 = vcombine.low %v1926_v59, %v1929_v60 }
  0x95   : > { %1313 = vmatprep.subr.bf16.mxu1 %v1810_v8  ;;  %1238 = vmatprep.mubr.bf16.mxu0 %v1104_v55 }
  0x96   : > { %1270 = vmatprep.mubr.bf16.mxu1 %v1121_v56 }
  0x97   : > { %1285 = vmatpush3.bf16.msra.mxu0 %v1810_v8 }
  0x98   : > { %1321 = vmatpush3.bf16.msra.mxu1 %v1810_v8  ;;  %1286 = vmatprep.subr.bf16.mxu0 %v1816_v11  ;;  %v773_v8 = vmul.bf16 %v1134_v4, %v1820_v13  ;;  %v775_v13 = vmul.bf16 %v1134_v4, %v1848_v27  ;;  %v1140_v27 = vcombine.low %v783_v19, %v784_v21 }
  0x99   : > { %1314 = vmatprep.subr.bf16.mxu1 %v1816_v11 }
  0x9a   : > { %1239 = vmatmul.mubr.bf16.gmra.mrb[8].mxu0 %v1105_v62  ;;  %v1136_v26 = vcombine.low %v775_v13, %v776_v14 }
  0x9b   : > { %1271 = vmatmul.mubr.bf16.gmra.mrb[8].mxu1 %v1122_v1  ;;  %1287 = vmatpush3.bf16.msra.mxu0 %v1816_v11 }
  0x9c   : > { %1322 = vmatpush3.bf16.msra.mxu1 %v1816_v11  ;;  %1288 = vmatprep.subr.bf16.mxu0 %v1827_v16  ;;  %v1135_v11 = vcombine.low %v773_v8, %v774_v10 }
  0x9d   : > { %1315 = vmatprep.subr.bf16.mxu1 %v1827_v16  ;;  %1242 = vmatprep.mubr.bf16.mxu0 %v1106_v5 }
  0x9e   : > { %1274 = vmatprep.mubr.bf16.mxu1 %v1123_v6 }
  0x9f   : > { %1289 = vmatpush3.bf16.msra.mxu0 %v1827_v16 }
  0xa0   : > { %1323 = vmatpush3.bf16.msra.mxu1 %v1827_v16  ;;  %1290 = vmatprep.subr.bf16.mxu0 %v1838_v22  ;;  %v777_v16 = vmul.bf16 %v1134_v4, %v1861_v33  ;;  %v788_v33 = vmul.bf16 %v1134_v4, %v290_v3 }
  0xa1   : > { %1316 = vmatprep.subr.bf16.mxu1 %v1838_v22 }
  0xa2   : > { %1243 = vmatmul.mubr.bf16.gmra.mrb[12].mxu0 %v1107_v12  ;;  %v1137_v28 = vcombine.low %v777_v16, %v778_v23  ;;  %v1142_v35 = vcombine.low %v787_v32, %v788_v33 }
  0xa3   : > { %1275 = vmatmul.mubr.bf16.gmra.mrb[12].mxu1 %v1124_v18  ;;  %1291 = vmatpush3.bf16.msra.mxu0 %v1838_v22 }
  0xa4   : > { %1324 = vmatpush3.bf16.msra.mxu1 %v1838_v22  ;;  %1292 = vmatprep.subr.bf16.mxu0 %v1854_v29  ;;  %v779_v22 = vmul.bf16 %v1134_v4, %v1877_v39 }
  0xa5   : > { %1317 = vmatprep.subr.bf16.mxu1 %v1854_v29  ;;  %1294 = vmatprep.mubr.bf16.mxu0 %v1135_v11 }
  0xa6   : > { %1302 = vmatprep.mubr.bf16.mxu1 %v1139_v20  ;;  %v1138_v34 = vcombine.low %v779_v22, %v780_v31 }
  0xa7   : > { %1293 = vmatpush3.bf16.msra.mxu0 %v1854_v29 }
  0xa8   : > { %1325 = vmatpush3.bf16.msra.mxu1 %v1854_v29 }
  0xaa   : > { %1295 = vmatmul.mubr.bf16.vlgmr.msra.gmra.mrb[16].mxu0 %v1136_v26 }
  0xab   : > { %1303 = vmatmul.mubr.bf16.vlgmr.msra.gmra.mrb[16].mxu1 %v1140_v27  ;;  %1298 = vmatprep.mubr.bf16.mxu0 %v1137_v28 }
  0xac   : > { %1306 = vmatprep.mubr.bf16.mxu1 %v1141_v30 }
  0xb2   : > { %1299 = vmatmul.mubr.bf16.gmra.mrb[20].mxu0 %v1138_v34 }
  0xb3   : > { %1307 = vmatmul.mubr.bf16.gmra.mrb[20].mxu1 %v1142_v35 }
 0x15d   : > { %v1232_v29 = vpop.f32.mrb[0].mxu0 }
 0x15e   : > { %v1987_v37 = vadd.f32 %v1232_v29, %v1983_v36  ;;  %v1264_v38 = vpop.f32.mrb[0].mxu1  ;;  %v444_v39 = vpop.f32.mrb[1].mxu0 }
 0x15f   : > { %v1990_v40 = vadd.f32 %v1983_v36, %v444_v39  ;;  %v681_v41 = vpop.f32.mrb[1].mxu1  ;;  %v1233_v42 = vpop.f32.mrb[2].mxu0 }
 0x160   : > { %v690_v43 = vadd.f32 %v1264_v38, %v1987_v37  ;;  %v1994_v44 = vadd.f32 %v1233_v42, %v1983_v36  ;;  %v1265_v45 = vpop.f32.mrb[2].mxu1  ;;  %v447_v46 = vpop.f32.mrb[3].mxu0 }
 0x161   : > { %v682_v47 = vadd.f32 %v681_v41, %v1990_v40  ;;  %v1998_v48 = vadd.f32 %v1983_v36, %v447_v46  ;;  %v684_v49 = vpop.f32.mrb[3].mxu1 }
 0x162   : > { %746 = vst [vmem:[%s2000_s13 + $0x10] sm:$0xff] %v690_v43  ;;  %v693_v50 = vadd.f32 %v1265_v45, %v1994_v44 }
 0x163   : > { %744 = vst [vmem:[%s2000_s13] sm:$0xff] %v682_v47  ;;  %v685_v51 = vadd.f32 %v684_v49, %v1998_v48 }
 0x164   : > { %747 = vst [vmem:[%s2000_s13 + $0x18] sm:$0xff] %v693_v50 }
 0x165   : > { %745 = vst [vmem:[%s2000_s13 + $0x8] sm:$0xff] %v685_v51  ;;  %v1236_v52 = vpop.f32.mrb[4].mxu0 }
 0x166   : > { %v2009_v53 = vadd.f32 %v1236_v52, %v1983_v36  ;;  %v1268_v54 = vpop.f32.mrb[4].mxu1  ;;  %v460_v55 = vpop.f32.mrb[5].mxu0 }
 0x167   : > { %v2012_v56 = vadd.f32 %v1983_v36, %v460_v55  ;;  %v697_v57 = vpop.f32.mrb[5].mxu1  ;;  %v1237_v58 = vpop.f32.mrb[6].mxu0 }
 0x168   : > { %v706_v59 = vadd.f32 %v1268_v54, %v2009_v53  ;;  %v2016_v60 = vadd.f32 %v1237_v58, %v1983_v36  ;;  %v1269_v61 = vpop.f32.mrb[6].mxu1  ;;  %v463_v62 = vpop.f32.mrb[7].mxu0 }
 0x169   : > { %v698_v63 = vadd.f32 %v697_v57, %v2012_v56  ;;  %v2020_v0 = vadd.f32 %v1983_v36, %v463_v62  ;;  %v700_v1 = vpop.f32.mrb[7].mxu1 }
 0x16a   : > { %750 = vst [vmem:[%s2000_s13 + $0x30] sm:$0xff] %v706_v59  ;;  %v709_v2 = vadd.f32 %v1269_v61, %v2016_v60 }
 0x16b   : > { %748 = vst [vmem:[%s2000_s13 + $0x20] sm:$0xff] %v698_v63  ;;  %v701_v3 = vadd.f32 %v700_v1, %v2020_v0 }
 0x16c   : > { %751 = vst [vmem:[%s2000_s13 + $0x38] sm:$0xff] %v709_v2 }
 0x16d   : > { %749 = vst [vmem:[%s2000_s13 + $0x28] sm:$0xff] %v701_v3  ;;  %v1240_v4 = vpop.f32.mrb[8].mxu0 }
 0x16e   : > { %v485_v5 = vadd.f32 %v1240_v4, %v1983_v36  ;;  %v1272_v6 = vpop.f32.mrb[8].mxu1  ;;  %v476_v7 = vpop.f32.mrb[9].mxu0 }
 0x16f   : > { %v477_v9 = vadd.f32 %v1983_v36, %v476_v7  ;;  %v713_v8 = vpop.f32.mrb[9].mxu1  ;;  %v1241_v10 = vpop.f32.mrb[10].mxu0 }
 0x170   : > { %v722_v12 = vadd.f32 %v1272_v6, %v485_v5  ;;  %v488_v15 = vadd.f32 %v1241_v10, %v1983_v36  ;;  %v1273_v17 = vpop.f32.mrb[10].mxu1  ;;  %v479_v18 = vpop.f32.mrb[11].mxu0 }
 0x171   : > { %v714_v11 = vadd.f32 %v713_v8, %v477_v9  ;;  %v480_v13 = vadd.f32 %v1983_v36, %v479_v18  ;;  %v716_v14 = vpop.f32.mrb[11].mxu1 }
 0x172   : > { %754 = vst [vmem:[%s2000_s13 + $0x50] sm:$0xff] %v722_v12  ;;  %v725_v19 = vadd.f32 %v1273_v17, %v488_v15 }
 0x173   : > { %752 = vst [vmem:[%s2000_s13 + $0x40] sm:$0xff] %v714_v11  ;;  %v717_v20 = vadd.f32 %v716_v14, %v480_v13 }
 0x174   : > { %755 = vst [vmem:[%s2000_s13 + $0x58] sm:$0xff] %v725_v19 }
 0x175   : > { %753 = vst [vmem:[%s2000_s13 + $0x48] sm:$0xff] %v717_v20  ;;  %v1244_v21 = vpop.f32.mrb[12].mxu0 }
 0x176   : > { %v501_v16 = vadd.f32 %v1244_v21, %v1983_v36  ;;  %v1276_v23 = vpop.f32.mrb[12].mxu1  ;;  %v492_v24 = vpop.f32.mrb[13].mxu0 }
 0x177   : > { %v493_v25 = vadd.f32 %v1983_v36, %v492_v24  ;;  %v729_v26 = vpop.f32.mrb[13].mxu1  ;;  %v1245_v27 = vpop.f32.mrb[14].mxu0 }
 0x178   : > { %v738_v28 = vadd.f32 %v1276_v23, %v501_v16  ;;  %v504_v30 = vadd.f32 %v1245_v27, %v1983_v36  ;;  %v1277_v22 = vpop.f32.mrb[14].mxu1  ;;  %v495_v31 = vpop.f32.mrb[15].mxu0 }
 0x179   : > { %v730_v32 = vadd.f32 %v729_v26, %v493_v25  ;;  %v496_v33 = vadd.f32 %v1983_v36, %v495_v31  ;;  %v732_v34 = vpop.f32.mrb[15].mxu1 }
 0x17a   : > { %758 = vst [vmem:[%s2000_s13 + $0x70] sm:$0xff] %v738_v28  ;;  %v741_v35 = vadd.f32 %v1277_v22, %v504_v30 }
 0x17b   : > { %756 = vst [vmem:[%s2000_s13 + $0x60] sm:$0xff] %v730_v32  ;;  %v733_v29 = vadd.f32 %v732_v34, %v496_v33 }
 0x17c   : > { %759 = vst [vmem:[%s2000_s13 + $0x78] sm:$0xff] %v741_v35 }
 0x17d   : > { %757 = vst [vmem:[%s2000_s13 + $0x68] sm:$0xff] %v733_v29  ;;  %v1296_v38 = vpop.f32.mrb[16].mxu0 }
 0x17e   : > { %v880_v39 = vadd.f32 %v1296_v38, %v1987_v37  ;;  %v1304_v41 = vpop.f32.mrb[16].mxu1  ;;  %v871_v42 = vpop.f32.mrb[17].mxu0 }
 0x17f   : > { %v912_v43 = vadd.f32 %v1304_v41, %v485_v5  ;;  %v872_v36 = vadd.f32 %v871_v42, %v1990_v40  ;;  %v903_v45 = vpop.f32.mrb[17].mxu1  ;;  %v1297_v46 = vpop.f32.mrb[18].mxu0 }
 0x180   : > { %1145 = vst [vmem:[%s2000_s13 + $0x90] sm:$0xff] %v880_v39  ;;  %v904_v47 = vadd.f32 %v903_v45, %v477_v9  ;;  %v883_v49 = vadd.f32 %v1297_v46, %v1994_v44  ;;  %v1305_v50 = vpop.f32.mrb[18].mxu1  ;;  %v874_v51 = vpop.f32.mrb[19].mxu0 }
 0x181   : > { %1153 = vst [vmem:[%s2000_s13 + $0xd0] sm:$0xff] %v912_v43  ;;  %1143 = vst [vmem:[%s2000_s13 + $0x80] sm:$0xff] %v872_v36  ;;  %v915_v37 = vadd.f32 %v1305_v50, %v488_v15  ;;  %v875_v52 = vadd.f32 %v874_v51, %v1998_v48  ;;  %v906_v54 = vpop.f32.mrb[19].mxu1 }
 0x182   : > { %1151 = vst [vmem:[%s2000_s13 + $0xc0] sm:$0xff] %v904_v47  ;;  %1146 = vst [vmem:[%s2000_s13 + $0x98] sm:$0xff] %v883_v49  ;;  %v907_v40 = vadd.f32 %v906_v54, %v480_v13 }
 0x183   : > { %1154 = vst [vmem:[%s2000_s13 + $0xd8] sm:$0xff] %v915_v37  ;;  %1144 = vst [vmem:[%s2000_s13 + $0x88] sm:$0xff] %v875_v52 }
 0x184   : > { %1152 = vst [vmem:[%s2000_s13 + $0xc8] sm:$0xff] %v907_v40 }
 0x185   : > { %v1300_v55 = vpop.f32.mrb[20].mxu0 }
 0x186   : > { %v896_v44 = vadd.f32 %v1300_v55, %v2009_v53  ;;  %v1308_v57 = vpop.f32.mrb[20].mxu1  ;;  %v887_v58 = vpop.f32.mrb[21].mxu0 }
 0x187   : > { %v928_v59 = vadd.f32 %v1308_v57, %v501_v16  ;;  %v888_v48 = vadd.f32 %v887_v58, %v2012_v56  ;;  %v919_v61 = vpop.f32.mrb[21].mxu1  ;;  %v1301_v62 = vpop.f32.mrb[22].mxu0 }
 0x188   : > { %1149 = vst [vmem:[%s2000_s13 + $0xb0] sm:$0xff] %v896_v44  ;;  %v920_v63 = vadd.f32 %v919_v61, %v493_v25  ;;  %v899_v1 = vadd.f32 %v1301_v62, %v2016_v60  ;;  %v1309_v2 = vpop.f32.mrb[22].mxu1  ;;  %v890_v3 = vpop.f32.mrb[23].mxu0 }
 0x189   : > { %1157 = vst [vmem:[%s2000_s13 + $0xf0] sm:$0xff] %v928_v59  ;;  %1147 = vst [vmem:[%s2000_s13 + $0xa0] sm:$0xff] %v888_v48  ;;  %v931_v53 = vadd.f32 %v1309_v2, %v504_v30  ;;  %v891_v4 = vadd.f32 %v890_v3, %v2020_v0  ;;  %v922_v5 = vpop.f32.mrb[23].mxu1 }
 0x18a   : > { %1155 = vst [vmem:[%s2000_s13 + $0xe0] sm:$0xff] %v920_v63  ;;  %1150 = vst [vmem:[%s2000_s13 + $0xb8] sm:$0xff] %v899_v1  ;;  %v923_v56 = vadd.f32 %v922_v5, %v496_v33 }
 0x18b   : > { %1158 = vst [vmem:[%s2000_s13 + $0xf8] sm:$0xff] %v931_v53  ;;  %1148 = vst [vmem:[%s2000_s13 + $0xa8] sm:$0xff] %v891_v4 }
 0x18c   : > { %1156 = vst [vmem:[%s2000_s13 + $0xe8] sm:$0xff] %v923_v56 }
 0x18d   : > { %s1165_s11 = sshll.u32 %s1625_s22, 11  ;;  %s981_s17 = sshll.u32 %s2000_s13, 4  ;;  %s982_s17 = int_to_ptr.vmem [resolvable:$true] %s981_s17 }
 0x18e   : > { %s964_s8 = scalar_lea.hbm %s2111_s5, %s1165_s11  ;;  %s1567_s9 = smov 2048  }
 0x18f   : > { %p2125_p11 = scmp.ne.s32.totalorder %s2120_s23, 0  ;;  %s1568_s14 = smov 4096  }
 0x190   : > { %s1569_s24 = smov 16   ;;  %s1570_s26 = smov 128  }
 0x191   : > { %1336 = sst [smem:[#allocation10]] (%p2125_p11), %s1567_s9  ;;  %s1571_s22 = smov 8  }
 0x192   : > { %1337 = sst [smem:[#allocation10 + $0x1]] (%p2125_p11), %s1568_s14  ;;  %s1572_s15 = smov [#allocation9]  }
 0x193   : > { %1338 = sst [smem:[#allocation10 + $0x2]] (%p2125_p11), %s1569_s24  ;;  %s1573_s16 = smov 0  }
 0x194   : > { %1339 = sst [smem:[#allocation10 + $0x3]] (%p2125_p11), %s1570_s26 }
 0x195   : > { %1340 = sst [smem:[#allocation10 + $0x4]] (%p2125_p11), %s1570_s26 }
 0x196   : > { %1341 = sst [smem:[#allocation10 + $0x5]] (%p2125_p11), %s1571_s22 }
 0x197   : > { %1342 = dma.general (%p2125_p11), %s982_s17, 4096, %s964_s8, %s952_s30, %s1572_s15, [#allocation10], %s1573_s16, 0  }
 0x198 PF: > { %s1009_s10 = sand.u32 1, %s1548_s18   ;;  %p2126_p0 = scmp.ne.s32.totalorder %s2116_s25, 0 }
 0x199   : > { %p2127_p2 = scmp.ge.s32.totalorder %s1560_s21, 2  ;;  %s1010_s28 = scalar_lea.sflag [#allocation4], %s1009_s10 }
 0x19b   : > { %p1356_p3 = pnand %p2127_p2, %p2126_p0 }
 0x19d   : > { %1543 = dma.done.wait (!%p1356_p3), %s1010_s28, 4096  }
 0x19e   : > { %1545 = vsyncadd (!%p1356_p3), %s1010_s28, 4294963200  ;;  %p19_p7 = scmp.ge.s32.totalorder %s1720_s29, 4   ;;  %s2128_s18 = smov %s1552_s19 }
 0x19f   : > { %s2129_s19 = smov %s1556_s20  ;;  %s2130_s20 = smov %s1736_s27 }
 0x1a0   : > { %s2131_s21 = smov %s1720_s29  ;;  %21 = sbr.rel (!%p19_p7) target bundleno = 6 (0x6), region = 100 }
 0x1a7   :  { %1015 = vsyncpa [#allocation3], 1 }
 0x1a8   :  { %1017 = vsyncpa [#allocation3 + $0x1], 1 }
 0x1a9   :  { %1018 = vsyncpa [#allocation6], 1 }
 0x1aa   :  { %1019 = vsyncpa [#allocation4], 1 }
 0x1ab   :  { %1021 = vsyncpa [#allocation4 + $0x1], 1 }

</bundles_post_ra>
